<compile_context>
chip_gen: v7x
topology: tpu7x:2x2x1
jax: 0.10.0
libtpu: 0.0.40
codegen_flags: <defaults>
</compile_context>

<pallas_src>
import functools

import jax
import jax.numpy as jnp
from jax import lax
from jax.experimental import pallas as pl
from jax.experimental.pallas import tpu as pltpu

_BN_EPS = 1e-5


def _round_up(x, m):
    return (x + m - 1) // m * m


# -------------- stage 1: fused hidden Linear -> BN -> PReLU stack ------------ #

def _make_hidden_kernel(n_hidden: int, residual: bool):
    """Ref order: slopes(SMEM), x, [w, b, gamma, beta] * n_hidden, h_out."""

    def kernel(*refs):
        slopes_ref = refs[0]                         # (n_hidden,) f32 in SMEM
        x_ref = refs[1]                              # (B, latent)
        hidden_refs = refs[2:2 + 4 * n_hidden]
        h_ref = refs[2 + 4 * n_hidden]               # (B, d_last) output

        h = x_ref[...].astype(jnp.float32)
        for i in range(n_hidden):
            w_ref, b_ref, g_ref, bt_ref = hidden_refs[4 * i:4 * i + 4]
            # Linear (operands in compute dtype, f32 accumulation on the MXU).
            z = jnp.dot(h.astype(w_ref.dtype), w_ref[...],
                        preferred_element_type=jnp.float32) + b_ref[...]
            # BatchNorm1d training-mode forward: biased batch stats over axis 0.
            mean = jnp.mean(z, axis=0, keepdims=True)
            cen = z - mean
            var = jnp.mean(cen * cen, axis=0, keepdims=True)
            y = g_ref[...] * (cen * lax.rsqrt(var + _BN_EPS)) + bt_ref[...]
            # PReLU with a single shared slope, read from SMEM (scalar path).
            a = slopes_ref[i]
            y = jnp.where(y > 0, y, a * y)
            # Residual add for middle hidden layers (module's residual=True).
            h = (y + h) if (residual and i > 0) else y
        h_ref[...] = h.astype(h_ref.dtype)

    return kernel


def _hidden_stack(x, prep, *, residual):
    B, latent = x.shape
    hidden = prep["hidden"]
    n_hidden = len(hidden)
    d_last = hidden[-1]["w"].shape[1]
    h_dtype = prep["wf"].dtype           # emit h in the matmul operand dtype

    inputs = [prep["slopes"], x]
    in_specs = [
        pl.BlockSpec(memory_space=pltpu.MemorySpace.SMEM),   # PReLU slopes
        pl.BlockSpec((B, latent), lambda i: (0, 0)),
    ]
    for p in hidden:
        din, dout = p["w"].shape
        inputs += [p["w"], p["b"], p["gamma"], p["beta"]]
        in_specs += [
            pl.BlockSpec((din, dout), lambda i: (0, 0)),
            pl.BlockSpec((1, dout), lambda i: (0, 0)),
            pl.BlockSpec((1, dout), lambda i: (0, 0)),
            pl.BlockSpec((1, dout), lambda i: (0, 0)),
        ]

    return pl.pallas_call(
        _make_hidden_kernel(n_hidden, residual),
        out_shape=jax.ShapeDtypeStruct((B, d_last), h_dtype),
        grid=(1,),
        in_specs=in_specs,
        out_specs=pl.BlockSpec((B, d_last), lambda i: (0, 0)),
        compiler_params=pltpu.CompilerParams(
            dimension_semantics=("arbitrary",)),
    )(*inputs)


# --------------- stage 2: streamed GEMM over the genes dimension ------------- #

def _make_genes_kernel(tn: int):
    def kernel(h_ref, wf_ref, bf_ref, o_ref):
        # Bias is fully resident; slice the current lane-dense tile.
        off = pl.multiple_of(pl.program_id(0) * tn, 128)
        out = jnp.dot(h_ref[...], wf_ref[...],
                      preferred_element_type=jnp.float32)
        out = out + bf_ref[:, pl.ds(off, tn)]
        o_ref[...] = out.astype(o_ref.dtype)

    return kernel


def decoder_forward(x, prep, *, tn, num_genes, residual=False,
                    out_dtype=jnp.float32):
    """Fused forward matching Decoder.forward (training-mode BN, dropout p=0)."""
    # TODO(synk): Dropout with p>0 and BN running-stat updates are not
    #             implemented (batch-stats forward only). PyTorch raises for
    #             B==1 in train mode; here B==1 gives var==0 (rsqrt(eps)).
    B = x.shape[0]

    # Hidden stack computed once (not per output tile).
    h = _hidden_stack(x, prep, residual=residual)

    wf, bf = prep["wf"], prep["bf"]
    d_last, n_pad = wf.shape
    n_tiles = n_pad // tn

    cost = pl.CostEstimate(
        flops=int(2 * B * d_last * n_pad),
        transcendentals=0,
        bytes_accessed=int(wf.size * wf.dtype.itemsize + bf.size * 4
                           + h.size * h.dtype.itemsize
                           + B * n_pad * jnp.dtype(out_dtype).itemsize),
    )

    # VMEM footprint (default 2-deep pipeline): 2 x (d_last x tn) wf buffers
    # + 2 x (B x tn) out buffers + resident h/bf -- a few MiB at tn<=4096,
    # well under v5e/v6e/v7x scoped-VMEM defaults.
    out = pl.pallas_call(
        _make_genes_kernel(tn),
        out_shape=jax.ShapeDtypeStruct((B, n_pad), out_dtype),
        grid=(n_tiles,),
        in_specs=[
            pl.BlockSpec((B, d_last), lambda j: (0, 0)),    # h: resident
            pl.BlockSpec((d_last, tn), lambda j: (0, j)),   # wf: streamed tiles
            pl.BlockSpec((1, n_pad), lambda j: (0, 0)),     # bias: resident
        ],
        out_specs=pl.BlockSpec((B, tn), lambda j: (0, j)),
        compiler_params=pltpu.CompilerParams(
            dimension_semantics=("parallel",)),             # megacore-shardable
        cost_estimate=cost,
    )(h, wf, bf)

    return out[:, :num_genes] if n_pad != num_genes else out


# --------------------------- parameter preparation --------------------------- #

def prepare_decoder_params(hidden_params, final_params, *, num_genes, tn=None,
                           compute_dtype=jnp.bfloat16):
    """One-time cast/pad of parameters OUTSIDE the jitted forward.

    Returns (prep_arrays, static_cfg) where static_cfg holds python ints
    (tn, num_genes) to pass as static kwargs to decoder_forward.
    """
    assert final_params["w_t"].shape[1] == num_genes

    slopes = jnp.concatenate(
        [p["a"].reshape(1).astype(jnp.float32) for p in hidden_params])
    hidden = [dict(w=p["w_t"].astype(compute_dtype),
                   b=p["b"].astype(jnp.float32),
                   gamma=p["gamma"].astype(jnp.float32),
                   beta=p["beta"].astype(jnp.float32))
              for p in hidden_params]

    wf = final_params["w_t"]
    bf = final_params["b"]
    d_last = wf.shape[0]

    if tn is None:
        itemsize = jnp.dtype(compute_dtype).itemsize
        # ~2 MiB per wf pipeline buffer, lane-dense multiple of 128, cap 4096.
        cap = max(128, ((2 << 20) // (d_last * itemsize)) // 128 * 128)
        tn = min(_round_up(num_genes, 128), cap, 4096)
    assert tn % 128 == 0

    n_pad = _round_up(num_genes, tn)
    if n_pad != num_genes:
        wf = jnp.pad(wf, ((0, 0), (0, n_pad - num_genes)))
        bf = jnp.pad(bf, ((0, 0), (0, n_pad - num_genes)))

    prep = dict(slopes=slopes, hidden=hidden,
                wf=wf.astype(compute_dtype), bf=bf.astype(jnp.float32))
    cfg = dict(tn=int(tn), num_genes=int(num_genes))
    return prep, cfg


# --------------------------- params / reference ------------------------------ #

def init_decoder_params(key, num_genes, latent_dim=64, hidden_dim=(128, 128)):
    """Synthetic params matching PyTorch shapes; Linear weights stored as
    (in, out) (pre-transposed); BN gamma=1, beta=0; PReLU a=0.25 (default)."""
    params = []
    dims = [latent_dim] + list(hidden_dim)
    for i in range(len(hidden_dim)):
        key, kw, kb = jax.random.split(key, 3)
        din, dout = dims[i], dims[i + 1]
        bound = 1.0 / jnp.sqrt(din)
        params.append(dict(
            w_t=jax.random.uniform(kw, (din, dout), jnp.float32, -bound, bound),
            b=jax.random.uniform(kb, (1, dout), jnp.float32, -bound, bound),
            gamma=jnp.ones((1, dout), jnp.float32),
            beta=jnp.zeros((1, dout), jnp.float32),
            a=jnp.full((1,), 0.25, jnp.float32),
        ))
    key, kw, kb = jax.random.split(key, 3)
    din = dims[-1]
    bound = 1.0 / jnp.sqrt(din)
    final = dict(
        w_t=jax.random.uniform(kw, (din, num_genes), jnp.float32, -bound, bound),
        b=jax.random.uniform(kb, (1, num_genes), jnp.float32, -bound, bound),
    )
    return params, final


def _decoder_reference(x, hidden_params, final_params, residual=False):
    """Pure-JAX f32 reference of Decoder.forward (training-mode BN)."""
    h = x
    for i, p in enumerate(hidden_params):
        z = jnp.dot(h, p["w_t"], precision=lax.Precision.HIGHEST) + p["b"]
        mean = jnp.mean(z, axis=0, keepdims=True)
        var = jnp.mean((z - mean) ** 2, axis=0, keepdims=True)
        y = p["gamma"] * (z - mean) / jnp.sqrt(var + _BN_EPS) + p["beta"]
        a = p["a"].reshape(())
        y = jnp.where(y > 0, y, a * y)
        h = (y + h) if (residual and i > 0) else y
    return jnp.dot(h, final_params["w_t"],
                   precision=lax.Precision.HIGHEST) + final_params["b"]


# ------------------------------ main ----------------------------------------- #

if __name__ == "__main__":
    key = jax.random.PRNGKey(0)

    # Small shapes consistent with the module defaults:
    # latent_dim=64, hidden=[128, 128]; num_genes=256.
    B, LATENT, HIDDEN, NUM_GENES = 8, 64, (128, 128), 256

    key, kp, kx = jax.random.split(key, 3)
    hidden_params, final_params = init_decoder_params(
        kp, num_genes=NUM_GENES, latent_dim=LATENT, hidden_dim=HIDDEN)
    x = jax.random.normal(kx, (B, LATENT), jnp.float32)

    ref = _decoder_reference(x, hidden_params, final_params, residual=False)

    # 1) f32 compute path: validate the two-stage kernel against pure-JAX
    #    reference (in-kernel dots use default precision vs HIGHEST in ref).
    prep32, cfg32 = prepare_decoder_params(
        hidden_params, final_params, num_genes=NUM_GENES,
        compute_dtype=jnp.float32)
    out_f32 = decoder_forward(x, prep32, residual=False, **cfg32)
    out_f32, ref = jax.block_until_ready((out_f32, ref))
    assert out_f32.shape == (B, NUM_GENES), out_f32.shape
    assert bool(jnp.allclose(out_f32, ref, atol=1e-2, rtol=1e-2)), \
        float(jnp.max(jnp.abs(out_f32 - ref)))

    # 2) Performance path: bf16 matmul operands (pre-cast/pre-padded outside
    #    jit), f32 accumulation, jitted. Validated with a looser tolerance.
    prep16, cfg16 = prepare_decoder_params(
        hidden_params, final_params, num_genes=NUM_GENES,
        compute_dtype=jnp.bfloat16)
    fwd = jax.jit(functools.partial(decoder_forward, residual=False, **cfg16))
    out_bf16 = jax.block_until_ready(fwd(x, prep16))
    assert out_bf16.shape == (B, NUM_GENES) and out_bf16.dtype == jnp.float32
    assert bool(jnp.all(jnp.isfinite(out_bf16)))
    assert bool(jnp.allclose(out_bf16, ref, atol=1e-1, rtol=1e-1)), \
        float(jnp.max(jnp.abs(out_bf16 - ref)))

    # 3) Residual variant (in-kernel residual add for middle hidden layers).
    ref_res = _decoder_reference(x, hidden_params, final_params, residual=True)
    out_res = decoder_forward(x, prep32, residual=True, **cfg32)
    out_res, ref_res = jax.block_until_ready((out_res, ref_res))
    assert out_res.shape == (B, NUM_GENES)
    assert bool(jnp.allclose(out_res, ref_res, atol=1e-2, rtol=1e-2)), \
        float(jnp.max(jnp.abs(out_res - ref_res)))

    # 4) num_genes not a multiple of 128: exercises pad + post-kernel slice.
    NG2 = 200
    fp_trim = dict(w_t=final_params["w_t"][:, :NG2], b=final_params["b"][:, :NG2])
    prep_p, cfg_p = prepare_decoder_params(
        hidden_params, fp_trim, num_genes=NG2, compute_dtype=jnp.float32)
    out_p = decoder_forward(x, prep_p, residual=False, **cfg_p)
    ref_p = _decoder_reference(x, hidden_params, fp_trim, residual=False)
    out_p, ref_p = jax.block_until_ready((out_p, ref_p))
    assert out_p.shape == (B, NG2), out_p.shape
    assert bool(jnp.allclose(out_p, ref_p, atol=1e-2, rtol=1e-2)), \
        float(jnp.max(jnp.abs(out_p - ref_p)))

    print("KERNEL_OK")
</pallas_src>

<mosaic_0001>
module attributes {stable_mosaic.version = 11 : i64} {
  func.func @kernel(%arg0: i32, %arg1: memref<2xf32, #tpu.memory_space<smem>>, %arg2: memref<8x64xf32, #tpu.memory_space<vmem>>, %arg3: memref<64x128xf32, #tpu.memory_space<vmem>>, %arg4: memref<1x128xf32, #tpu.memory_space<vmem>>, %arg5: memref<1x128xf32, #tpu.memory_space<vmem>>, %arg6: memref<1x128xf32, #tpu.memory_space<vmem>>, %arg7: memref<128x128xf32, #tpu.memory_space<vmem>>, %arg8: memref<1x128xf32, #tpu.memory_space<vmem>>, %arg9: memref<1x128xf32, #tpu.memory_space<vmem>>, %arg10: memref<1x128xf32, #tpu.memory_space<vmem>>, %arg11: memref<8x128xf32, #tpu.memory_space<vmem>>) attributes {dimension_semantics = [#tpu.dimension_semantics<arbitrary>], iteration_bounds = array<i64: 1>, scalar_prefetch = 0 : i64, scratch_operands = 0 : i64, tpu.core_type = #tpu.core_type<tc>, window_params = [{transform_indices = @transform_0, window_bounds = array<i64: 2>}, {pipeline_mode = #tpu.pipeline_mode<synchronous>, transform_indices = @transform_1, window_bounds = array<i64: 8, 64>}, {pipeline_mode = #tpu.pipeline_mode<synchronous>, transform_indices = @transform_2, window_bounds = array<i64: 64, 128>}, {pipeline_mode = #tpu.pipeline_mode<synchronous>, transform_indices = @transform_3, window_bounds = array<i64: 1, 128>}, {pipeline_mode = #tpu.pipeline_mode<synchronous>, transform_indices = @transform_4, window_bounds = array<i64: 1, 128>}, {pipeline_mode = #tpu.pipeline_mode<synchronous>, transform_indices = @transform_5, window_bounds = array<i64: 1, 128>}, {pipeline_mode = #tpu.pipeline_mode<synchronous>, transform_indices = @transform_6, window_bounds = array<i64: 128, 128>}, {pipeline_mode = #tpu.pipeline_mode<synchronous>, transform_indices = @transform_7, window_bounds = array<i64: 1, 128>}, {pipeline_mode = #tpu.pipeline_mode<synchronous>, transform_indices = @transform_8, window_bounds = array<i64: 1, 128>}, {pipeline_mode = #tpu.pipeline_mode<synchronous>, transform_indices = @transform_9, window_bounds = array<i64: 1, 128>}, {pipeline_mode = #tpu.pipeline_mode<synchronous>, transform_indices = @transform_10, window_bounds = array<i64: 8, 128>}]} {
    %c0 = arith.constant 0 : index
    %c0_0 = arith.constant 0 : index
    %0 = vector.load %arg2[%c0, %c0_0] : memref<8x64xf32, #tpu.memory_space<vmem>>, vector<8x64xf32>
    %c0_1 = arith.constant 0 : index
    %c0_2 = arith.constant 0 : index
    %1 = vector.load %arg3[%c0_1, %c0_2] : memref<64x128xf32, #tpu.memory_space<vmem>>, vector<64x128xf32>
    %cst = arith.constant dense<0.000000e+00> : vector<8x128xf32>
    %2 = tpu.matmul %0, %1, %cst {dimension_numbers = #tpu.dot_dimension_numbers<[1], [0], [0], [1], [0, 0, 1, 1], [], []>} : vector<8x64xf32>, vector<64x128xf32>, vector<8x128xf32> -> vector<8x128xf32>
    %c0_3 = arith.constant 0 : index
    %c0_4 = arith.constant 0 : index
    %3 = vector.load %arg4[%c0_3, %c0_4] : memref<1x128xf32, #tpu.memory_space<vmem>>, vector<1x128xf32>
    %4 = vector.broadcast %3 : vector<1x128xf32> to vector<8x128xf32>
    %5 = arith.addf %2, %4 : vector<8x128xf32>
    %cst_5 = arith.constant dense<0.000000e+00> : vector<128xf32>
    %6 = vector.multi_reduction <add>, %5, %cst_5 [0] : vector<8x128xf32> to vector<128xf32>
    %7 = vector.shape_cast %6 : vector<128xf32> to vector<1x128xf32>
    %cst_6 = arith.constant 8.000000e+00 : f32
    %8 = vector.broadcast %cst_6 : f32 to vector<1x128xf32>
    %9 = arith.divf %7, %8 : vector<1x128xf32>
    %10 = vector.broadcast %9 : vector<1x128xf32> to vector<8x128xf32>
    %11 = arith.subf %5, %10 : vector<8x128xf32>
    %12 = arith.mulf %11, %11 : vector<8x128xf32>
    %cst_7 = arith.constant dense<0.000000e+00> : vector<128xf32>
    %13 = vector.multi_reduction <add>, %12, %cst_7 [0] : vector<8x128xf32> to vector<128xf32>
    %14 = vector.shape_cast %13 : vector<128xf32> to vector<1x128xf32>
    %cst_8 = arith.constant 8.000000e+00 : f32
    %15 = vector.broadcast %cst_8 : f32 to vector<1x128xf32>
    %16 = arith.divf %14, %15 : vector<1x128xf32>
    %c0_9 = arith.constant 0 : index
    %c0_10 = arith.constant 0 : index
    %17 = vector.load %arg5[%c0_9, %c0_10] : memref<1x128xf32, #tpu.memory_space<vmem>>, vector<1x128xf32>
    %cst_11 = arith.constant 9.99999974E-6 : f32
    %18 = vector.broadcast %cst_11 : f32 to vector<1x128xf32>
    %19 = arith.addf %16, %18 : vector<1x128xf32>
    %20 = math.rsqrt %19 : vector<1x128xf32>
    %21 = vector.broadcast %20 : vector<1x128xf32> to vector<8x128xf32>
    %22 = arith.mulf %11, %21 : vector<8x128xf32>
    %23 = vector.broadcast %17 : vector<1x128xf32> to vector<8x128xf32>
    %24 = arith.mulf %23, %22 : vector<8x128xf32>
    %c0_12 = arith.constant 0 : index
    %c0_13 = arith.constant 0 : index
    %25 = vector.load %arg6[%c0_12, %c0_13] : memref<1x128xf32, #tpu.memory_space<vmem>>, vector<1x128xf32>
    %26 = vector.broadcast %25 : vector<1x128xf32> to vector<8x128xf32>
    %27 = arith.addf %24, %26 : vector<8x128xf32>
    %c0_14 = arith.constant 0 : index
    %28 = memref.load %arg1[%c0_14] : memref<2xf32, #tpu.memory_space<smem>>
    %cst_15 = arith.constant 0.000000e+00 : f32
    %29 = vector.broadcast %cst_15 : f32 to vector<8x128xf32>
    %30 = arith.cmpf ogt, %27, %29 : vector<8x128xf32>
    %31 = vector.broadcast %28 : f32 to vector<8x128xf32>
    %32 = arith.mulf %31, %27 : vector<8x128xf32>
    %33 = arith.select %30, %27, %32 : vector<8x128xi1>, vector<8x128xf32>
    %c0_16 = arith.constant 0 : index
    %c0_17 = arith.constant 0 : index
    %34 = vector.load %arg7[%c0_16, %c0_17] : memref<128x128xf32, #tpu.memory_space<vmem>>, vector<128x128xf32>
    %cst_18 = arith.constant dense<0.000000e+00> : vector<8x128xf32>
    %35 = tpu.matmul %33, %34, %cst_18 {dimension_numbers = #tpu.dot_dimension_numbers<[1], [0], [0], [1], [0, 0, 1, 1], [], []>} : vector<8x128xf32>, vector<128x128xf32>, vector<8x128xf32> -> vector<8x128xf32>
    %c0_19 = arith.constant 0 : index
    %c0_20 = arith.constant 0 : index
    %36 = vector.load %arg8[%c0_19, %c0_20] : memref<1x128xf32, #tpu.memory_space<vmem>>, vector<1x128xf32>
    %37 = vector.broadcast %36 : vector<1x128xf32> to vector<8x128xf32>
    %38 = arith.addf %35, %37 : vector<8x128xf32>
    %cst_21 = arith.constant dense<0.000000e+00> : vector<128xf32>
    %39 = vector.multi_reduction <add>, %38, %cst_21 [0] : vector<8x128xf32> to vector<128xf32>
    %40 = vector.shape_cast %39 : vector<128xf32> to vector<1x128xf32>
    %cst_22 = arith.constant 8.000000e+00 : f32
    %41 = vector.broadcast %cst_22 : f32 to vector<1x128xf32>
    %42 = arith.divf %40, %41 : vector<1x128xf32>
    %43 = vector.broadcast %42 : vector<1x128xf32> to vector<8x128xf32>
    %44 = arith.subf %38, %43 : vector<8x128xf32>
    %45 = arith.mulf %44, %44 : vector<8x128xf32>
    %cst_23 = arith.constant dense<0.000000e+00> : vector<128xf32>
    %46 = vector.multi_reduction <add>, %45, %cst_23 [0] : vector<8x128xf32> to vector<128xf32>
    %47 = vector.shape_cast %46 : vector<128xf32> to vector<1x128xf32>
    %cst_24 = arith.constant 8.000000e+00 : f32
    %48 = vector.broadcast %cst_24 : f32 to vector<1x128xf32>
    %49 = arith.divf %47, %48 : vector<1x128xf32>
    %c0_25 = arith.constant 0 : index
    %c0_26 = arith.constant 0 : index
    %50 = vector.load %arg9[%c0_25, %c0_26] : memref<1x128xf32, #tpu.memory_space<vmem>>, vector<1x128xf32>
    %cst_27 = arith.constant 9.99999974E-6 : f32
    %51 = vector.broadcast %cst_27 : f32 to vector<1x128xf32>
    %52 = arith.addf %49, %51 : vector<1x128xf32>
    %53 = math.rsqrt %52 : vector<1x128xf32>
    %54 = vector.broadcast %53 : vector<1x128xf32> to vector<8x128xf32>
    %55 = arith.mulf %44, %54 : vector<8x128xf32>
    %56 = vector.broadcast %50 : vector<1x128xf32> to vector<8x128xf32>
    %57 = arith.mulf %56, %55 : vector<8x128xf32>
    %c0_28 = arith.constant 0 : index
    %c0_29 = arith.constant 0 : index
    %58 = vector.load %arg10[%c0_28, %c0_29] : memref<1x128xf32, #tpu.memory_space<vmem>>, vector<1x128xf32>
    %59 = vector.broadcast %58 : vector<1x128xf32> to vector<8x128xf32>
    %60 = arith.addf %57, %59 : vector<8x128xf32>
    %c1 = arith.constant 1 : index
    %61 = memref.load %arg1[%c1] : memref<2xf32, #tpu.memory_space<smem>>
    %cst_30 = arith.constant 0.000000e+00 : f32
    %62 = vector.broadcast %cst_30 : f32 to vector<8x128xf32>
    %63 = arith.cmpf ogt, %60, %62 : vector<8x128xf32>
    %64 = vector.broadcast %61 : f32 to vector<8x128xf32>
    %65 = arith.mulf %64, %60 : vector<8x128xf32>
    %66 = arith.select %63, %60, %65 : vector<8x128xi1>, vector<8x128xf32>
    %c0_31 = arith.constant 0 : index
    %c0_32 = arith.constant 0 : index
    %67 = vector.load %arg11[%c0_31, %c0_32] : memref<8x128xf32, #tpu.memory_space<vmem>>, vector<8x128xf32>
    tpu.vector_store %arg11[%c0_31, %c0_32], %66 {strides = array<i32>} : memref<8x128xf32, #tpu.memory_space<vmem>>, vector<8x128xf32>,
    return
  }
  func.func @transform_0(%arg0: i32) -> i32 {
    %c0_i32 = arith.constant 0 : i32
    %c0_i32_0 = arith.constant 0 : i32
    return %c0_i32 : i32
  }
  func.func @transform_1(%arg0: i32) -> (i32, i32) {
    %c0_i32 = arith.constant 0 : i32
    %c0_i32_0 = arith.constant 0 : i32
    %c0_i32_1 = arith.constant 0 : i32
    return %c0_i32, %c0_i32_0 : i32, i32
  }
  func.func @transform_2(%arg0: i32) -> (i32, i32) {
    %c0_i32 = arith.constant 0 : i32
    %c0_i32_0 = arith.constant 0 : i32
    %c0_i32_1 = arith.constant 0 : i32
    return %c0_i32, %c0_i32_0 : i32, i32
  }
  func.func @transform_3(%arg0: i32) -> (i32, i32) {
    %c0_i32 = arith.constant 0 : i32
    %c0_i32_0 = arith.constant 0 : i32
    %c0_i32_1 = arith.constant 0 : i32
    return %c0_i32, %c0_i32_0 : i32, i32
  }
  func.func @transform_4(%arg0: i32) -> (i32, i32) {
    %c0_i32 = arith.constant 0 : i32
    %c0_i32_0 = arith.constant 0 : i32
    %c0_i32_1 = arith.constant 0 : i32
    return %c0_i32, %c0_i32_0 : i32, i32
  }
  func.func @transform_5(%arg0: i32) -> (i32, i32) {
    %c0_i32 = arith.constant 0 : i32
    %c0_i32_0 = arith.constant 0 : i32
    %c0_i32_1 = arith.constant 0 : i32
    return %c0_i32, %c0_i32_0 : i32, i32
  }
  func.func @transform_6(%arg0: i32) -> (i32, i32) {
    %c0_i32 = arith.constant 0 : i32
    %c0_i32_0 = arith.constant 0 : i32
    %c0_i32_1 = arith.constant 0 : i32
    return %c0_i32, %c0_i32_0 : i32, i32
  }
  func.func @transform_7(%arg0: i32) -> (i32, i32) {
    %c0_i32 = arith.constant 0 : i32
    %c0_i32_0 = arith.constant 0 : i32
    %c0_i32_1 = arith.constant 0 : i32
    return %c0_i32, %c0_i32_0 : i32, i32
  }
  func.func @transform_8(%arg0: i32) -> (i32, i32) {
    %c0_i32 = arith.constant 0 : i32
    %c0_i32_0 = arith.constant 0 : i32
    %c0_i32_1 = arith.constant 0 : i32
    return %c0_i32, %c0_i32_0 : i32, i32
  }
  func.func @transform_9(%arg0: i32) -> (i32, i32) {
    %c0_i32 = arith.constant 0 : i32
    %c0_i32_0 = arith.constant 0 : i32
    %c0_i32_1 = arith.constant 0 : i32
    return %c0_i32, %c0_i32_0 : i32, i32
  }
  func.func @transform_10(%arg0: i32) -> (i32, i32) {
    %c0_i32 = arith.constant 0 : i32
    %c0_i32_0 = arith.constant 0 : i32
    %c0_i32_1 = arith.constant 0 : i32
    return %c0_i32, %c0_i32_0 : i32, i32
  }
}

</mosaic_0001>

<bundles_post_ra>
// kernel: tpu_custom_call.1
= control target key start
LH: loop header
LB: loop body
LE: loop exit
PB: predicated region body
PF: predicated region fallthrough
CT: control target
= control target key end

     0   :  { %15 = vsyncpa [#allocation5], 0  ;;  %s780_s0 = inlined_call_operand.hbm [shape: f32[2], index: 0, kind: input, shape index: {}]   ;;  %s781_s1 = inlined_call_operand.hbm [shape: f32[8,64], index: 1, kind: input, shape index: {}]   ;;  %s782_s2 = inlined_call_operand.hbm [shape: f32[64,128], index: 2, kind: input, shape index: {}]   ;;  %s783_s3 = inlined_call_operand.vmem [shape: f32[1,128], index: 3, kind: input, shape index: {}]   ;;  %s784_s4 = inlined_call_operand.vmem [shape: f32[1,128], index: 4, kind: input, shape index: {}]   ;;  %s785_s5 = inlined_call_operand.vmem [shape: f32[1,128], index: 5, kind: input, shape index: {}]   ;;  %s786_s6 = inlined_call_operand.hbm [shape: f32[128,128], index: 6, kind: input, shape index: {}]   ;;  %s787_s7 = inlined_call_operand.vmem [shape: f32[1,128], index: 7, kind: input, shape index: {}]   ;;  %s788_s8 = inlined_call_operand.vmem [shape: f32[1,128], index: 8, kind: input, shape index: {}]   ;;  %s789_s9 = inlined_call_operand.vmem [shape: f32[1,128], index: 9, kind: input, shape index: {}]   ;;  %s790_s10 = inlined_call_operand.hbm [shape: f32[8,128], index: 10, kind: output, shape index: {}]  }
   0x1   :  { %16 = vsyncpa [#allocation3], 0 }
   0x2   :  { %17 = vsyncpa [#allocation8], 0 }
   0x3   :  { %18 = vsyncpa [#allocation4], 0  ;;  %s612_s13 = smov [#allocation7]   ;;  %s506_s17 = scalar_lea.hbm %s782_s2, 1024 }
   0x4   :  { %s42_s14 = sshll.u32 %s612_s13, 4  ;;  %p507_p0 = scmp.ne.s32.totalorder %s782_s2, %s506_s17  ;;  %s43_s14 = int_to_ptr.vmem [resolvable:$true] %s42_s14 }
   0x5   :  { %p510_p1 = scmp.lt.u32.totalorder %s506_s17, %s782_s2 }
   0x7   :  { %p512_p2 = pnand %p510_p1, %p507_p0 }
   0x9   :  { %515 = shalt.err (!%p512_p2)
}
   0xa   :  { %s516_s22 = scalar_lea.vmem %s43_s14, 1024  ;;  %p521_p4 = scmp.lt.s32.totalorder %s43_s14, %s43_s14 }
   0xb   :  { %p517_p3 = scmp.ne.s32.totalorder %s43_s14, %s516_s22  ;;  %p522_p5 = scmp.lt.s32.totalorder %s516_s22, %s516_s22 }
   0xd   :  { %p523_p6 = por %p522_p5, %p521_p4 }
   0xf   :  { %p524_p7 = pnand %p523_p6, %p517_p3 }
  0x11   :  { %527 = shalt.err (!%p524_p7)
}
  0x12   :  { %s613_s23 = smov 128   ;;  %s614_s24 = smov 8  }
  0x13   :  { %48 = dma.hbm_to_vmem [thread:$0]  %s782_s2, 1024, %s43_s14, [#allocation8], %s613_s23, %s613_s23, %s614_s24  }
  0x14   :  { %s528_s29 = scalar_lea.hbm %s780_s0, 16 }
  0x15   :  { %p529_p8 = scmp.ne.s32.totalorder %s780_s0, %s528_s29  ;;  %p532_p9 = scmp.lt.u32.totalorder %s528_s29, %s780_s0 }
  0x17   :  { %p534_p10 = pnand %p532_p9, %p529_p8 }
  0x19   :  { %537 = shalt.err (!%p534_p10)
}
  0x1a   :  { %s615_s15 = smov [#allocation2]   ;;  %s616_s2 = smov [#allocation6]  }
  0x1b   :  { %26 = dma.hbm_to_smem %s780_s0, 16, %s615_s15, [#allocation5]  }
  0x1c   :  { %s33_s14 = sshll.u32 %s616_s2, 4  ;;  %s617_s18 = smov [#allocation9]   ;;  %s34_s14 = int_to_ptr.vmem [resolvable:$true] %s33_s14 }
  0x1d   :  { %s60_s19 = sshll.u32 %s617_s18, 4  ;;  %s538_s22 = scalar_lea.hbm %s781_s1, 128  ;;  %s704_s19 = int_to_ptr.vmem [resolvable:$true] %s60_s19 }
  0x1e   :  { %p539_p11 = scmp.ne.s32.totalorder %s781_s1, %s538_s22  ;;  %p542_p12 = scmp.lt.u32.totalorder %s538_s22, %s781_s1 }
  0x20   :  { %p544_p13 = pnand %p542_p12, %p539_p11 }
  0x22   :  { %547 = shalt.err (!%p544_p13)
}
  0x23   :  { %s548_s0 = scalar_lea.vmem %s34_s14, 128  ;;  %p553_p1 = scmp.lt.s32.totalorder %s34_s14, %s34_s14 }
  0x24   :  { %p549_p0 = scmp.ne.s32.totalorder %s34_s14, %s548_s0  ;;  %p554_p2 = scmp.lt.s32.totalorder %s548_s0, %s548_s0 }
  0x26   :  { %p555_p3 = por %p554_p2, %p553_p1 }
  0x28   :  { %p556_p4 = pnand %p555_p3, %p549_p0 }
  0x2a   :  { %559 = shalt.err (!%p556_p4)
}
  0x2b   :  { %36 = dma.hbm_to_vmem [thread:$0]  %s781_s1, 128, %s34_s14, [#allocation3]  }
  0x2c   :  { %s560_s13 = scalar_lea.hbm %s786_s6, 2048 }
  0x2d   :  { %p561_p5 = scmp.ne.s32.totalorder %s786_s6, %s560_s13  ;;  %p564_p6 = scmp.lt.u32.totalorder %s560_s13, %s786_s6 }
  0x2f   :  { %p566_p7 = pnand %p564_p6, %p561_p5 }
  0x31   :  { %569 = shalt.err (!%p566_p7)
}
  0x32   :  { %s570_s18 = scalar_lea.vmem %s704_s19, 2048  ;;  %p575_p9 = scmp.lt.s32.totalorder %s704_s19, %s704_s19 }
  0x33   :  { %p571_p8 = scmp.ne.s32.totalorder %s704_s19, %s570_s18  ;;  %p576_p10 = scmp.lt.s32.totalorder %s570_s18, %s570_s18 }
  0x35   :  { %p577_p11 = por %p576_p10, %p575_p9 }
  0x37   :  { %p578_p12 = pnand %p577_p11, %p571_p8 }
  0x39   :  { %581 = shalt.err (!%p578_p12)
}
  0x3a   :  { %66 = dma.hbm_to_vmem [thread:$0]  %s786_s6, 2048, %s704_s19, [#allocation8], %s613_s23, %s613_s23, %s614_s24  }
  0x3b   :  { %604 = dma.done.wait [#allocation5], 16  }
  0x3c   :  { %605 = vsyncadd [#allocation5], 4294967280 }
  0x3d   :  { %606 = dma.done.wait [#allocation3], 128  }
  0x3e   :  { %607 = vsyncadd [#allocation3], 4294967168 }
  0x3f   :  { %608 = dma.done.wait [#allocation8], 3072  }
  0x40   :  { %609 = vsyncadd [#allocation8], 4294964224 }
  0x41   :  { %85 = sfence }
  0x42   :  { %v87_v0 = vld [vmem:[#allocation7] sm:$0xff]  ;;  %v88_v1 = vld [vmem:[#allocation7 + $0x8] sm:$0xff]  ;;  %v89_v2 = vld [vmem:[#allocation7 + $0x10] sm:$0xff]  ;;  %v618_v3 = vmov 0.0|0.0   ;;  %vm619_vm0 = vmmov 0   ;;  %v620_v6 = vmov 0.0  }
  0x43   :  { %456 = vmatprep.subr.bf16.mxu0 %v618_v3  ;;  %v457_v4 = vpack.c.bf16 %v88_v1, %v87_v0  ;;  %v90_v5 = vld [vmem:[#allocation7 + $0x18] sm:$0xff]  ;;  %418 = vmatprep.mubr.msk.f32.mxu0 %vm619_vm0, %v620_v6  ;;  %v91_v8 = vld [vmem:[#allocation7 + $0x20] sm:$0xff]  ;;  %v92_v9 = vld [vmem:[#allocation7 + $0x28] sm:$0xff]  ;;  %vm102_vm1 = vcmask 523264   ;;  %s621_s28 = smov [#allocation10]  }
  0x44   :  { %468 = vmatprep.subr.bf16.mxu1 %v618_v3  ;;  %453 = vmatprep.mubr.msk.f32.mxu1 %vm619_vm0, %v620_v6  ;;  %v460_v7 = vpack.c.bf16 %v90_v5, %v89_v2  ;;  %v463_v10 = vpack.c.bf16 %v92_v9, %v91_v8  ;;  %v93_v11 = vld [vmem:[#allocation7 + $0x30] sm:$0xff]  ;;  %v94_v12 = vld [vmem:[#allocation7 + $0x38] sm:$0xff]  ;;  %v217_v15 = vld [vmem:[#allocation9] sm:$0xff]  ;;  %s357_s0 = sshll.u32 %s621_s28, 4  ;;  %s358_s0 = int_to_ptr.vmem [resolvable:$true] %s357_s0 }
  0x45   :  { %458 = vmatpush3.bf16.msra.mxu0 %v457_v4  ;;  %v466_v13 = vpack.c.bf16 %v94_v12, %v93_v11  ;;  %v86_v14 = vld [vmem:[#allocation6] sm:$0xff]  ;;  %v218_v16 = vld [vmem:[#allocation9 + $0x8] sm:$0xff]  ;;  %v219_v18 = vld [vmem:[#allocation9 + $0x10] sm:$0xff]  ;;  %s582_s29 = scalar_lea.vmem %s358_s0, 128  ;;  %p587_p0 = scmp.lt.s32.totalorder %s358_s0, %s358_s0 }
  0x46   :  { %459 = vmatprep.subr.bf16.mxu0 %v618_v3  ;;  %v469_v17 = vpack.c.bf16 %v218_v16, %v217_v15  ;;  %v220_v19 = vld [vmem:[#allocation9 + $0x18] sm:$0xff]  ;;  %v221_v21 = vld [vmem:[#allocation9 + $0x20] sm:$0xff]  ;;  %v222_v22 = vld [vmem:[#allocation9 + $0x28] sm:$0xff]  ;;  %p583_p13 = scmp.ne.s32.totalorder %s358_s0, %s582_s29  ;;  %p588_p1 = scmp.lt.s32.totalorder %s582_s29, %s582_s29 }
  0x47   :  { %v472_v20 = vpack.c.bf16 %v220_v19, %v219_v18  ;;  %v475_v23 = vpack.c.bf16 %v222_v22, %v221_v21  ;;  %v223_v24 = vld [vmem:[#allocation9 + $0x30] sm:$0xff]  ;;  %v224_v25 = vld [vmem:[#allocation9 + $0x38] sm:$0xff]  ;;  %v225_v27 = vld [vmem:[#allocation9 + $0x40] sm:$0xff] }
  0x48   :  { %470 = vmatpush3.bf16.msra.mxu1 %v469_v17  ;;  %v478_v26 = vpack.c.bf16 %v224_v25, %v223_v24  ;;  %v226_v28 = vld [vmem:[#allocation9 + $0x48] sm:$0xff]  ;;  %v227_v30 = vld [vmem:[#allocation9 + $0x50] sm:$0xff]  ;;  %v228_v31 = vld [vmem:[#allocation9 + $0x58] sm:$0xff]  ;;  %p589_p2 = por %p588_p1, %p587_p0 }
  0x49   :  { %461 = vmatpush3.bf16.msra.mxu0 %v460_v7  ;;  %471 = vmatprep.subr.bf16.mxu1 %v618_v3  ;;  %v481_v29 = vpack.c.bf16 %v226_v28, %v225_v27  ;;  %v484_v32 = vpack.c.bf16 %v228_v31, %v227_v30  ;;  %v229_v33 = vld [vmem:[#allocation9 + $0x60] sm:$0xff]  ;;  %v230_v34 = vld [vmem:[#allocation9 + $0x68] sm:$0xff]  ;;  %v231_v36 = vld [vmem:[#allocation9 + $0x70] sm:$0xff] }
  0x4a   :  { %462 = vmatprep.subr.bf16.mxu0 %v618_v3  ;;  %v487_v35 = vpack.c.bf16 %v230_v34, %v229_v33  ;;  %v232_v37 = vld [vmem:[#allocation9 + $0x78] sm:$0xff]  ;;  %p590_p3 = pnand %p589_p2, %p583_p13 }
  0x4b   :  { %v490_v38 = vpack.c.bf16 %v232_v37, %v231_v36  ;;  %v368_v39 = vld [vmem:[%s783_s3] ss:$0 sm:$0xff]  ;;  %s212_s3 = sld [smem:[#allocation2]] }
  0x4c   :  { %473 = vmatpush3.bf16.msra.mxu1 %v472_v20  ;;  %v370_v61 = vld [vmem:[%s784_s4] ss:$0 sm:$0xff]  ;;  %s375_s4 = sld [smem:[#allocation2 + $0x1]] }
  0x4d   :  { %464 = vmatpush3.bf16.msra.mxu0 %v463_v10  ;;  %474 = vmatprep.subr.bf16.mxu1 %v618_v3  ;;  %v371_v63 = vld [vmem:[%s785_s5] ss:$0 sm:$0xff] }
  0x4e   :  { %465 = vmatprep.subr.bf16.mxu0 %v618_v3  ;;  %v372_v5 = vld [vmem:[%s787_s7] ss:$0 sm:$0xff] }
  0x4f   :  { %v373_v27 = vld [vmem:[%s788_s8] ss:$0 sm:$0xff] }
  0x50   :  { %476 = vmatpush3.bf16.msra.mxu1 %v475_v23 }
  0x51   :  { %467 = vmatpush3.bf16.msra.mxu0 %v466_v13  ;;  %477 = vmatprep.subr.bf16.mxu1 %v618_v3  ;;  %v214_v1 = vstv %s212_s3 }
  0x52   :  { %v347_v31 = vstv %s375_s4 }
  0x54   :  { %419 = vmatmul.mubr.msk.f32.vlgmr.msra.gmra.mrb[0].mxu0 %vm102_vm1, %v86_v14  ;;  %479 = vmatpush3.bf16.msra.mxu1 %v478_v26 }
  0x55   :  { %480 = vmatprep.subr.bf16.mxu1 %v618_v3 }
  0x58   :  { %482 = vmatpush3.bf16.msra.mxu1 %v481_v29  ;;  %v374_v29 = vld [vmem:[%s789_s9] ss:$0 sm:$0xff] }
  0x59   :  { %483 = vmatprep.subr.bf16.mxu1 %v618_v3 }
  0x5c   :  { %485 = vmatpush3.bf16.msra.mxu1 %v484_v32 }
  0x5d   :  { %486 = vmatprep.subr.bf16.mxu1 %v618_v3 }
  0x60   :  { %488 = vmatpush3.bf16.msra.mxu1 %v487_v35 }
  0x61   :  { %489 = vmatprep.subr.bf16.mxu1 %v618_v3 }
  0x64   :  { %491 = vmatpush3.bf16.msra.mxu1 %v490_v38 }
 0x127   :  { %v172_v40 = vpop.f32.mrb[0].mxu0 }
 0x128   :  { %v173_v41 = vadd.f32 %v368_v39, %v172_v40  ;;  %v420_v42 = vpop.f32.mrb[1].mxu0 }
 0x12a   :  { %v176_v43 = vrot.slane %v173_v41, 4 }
 0x12c   :  { %v177_v44 = vadd.f32 %v176_v43, %v173_v41 }
 0x12e   :  { %v178_v45 = vrot.slane %v177_v44, 2 }
 0x130   :  { %v179_v46 = vadd.f32 %v178_v45, %v177_v44 }
 0x132   :  { %v180_v47 = vrot.slane %v179_v46, 1 }
 0x134   :  { %v181_v48 = vadd.f32 %v180_v47, %v179_v46 }
 0x136   :  { %v183_v49 = vmul.f32 0.125, %v181_v48 }
 0x138   :  { %v184_v50 = vsub.f32 %v173_v41, %v183_v49 }
 0x13a   :  { %v185_v51 = vmul.f32 %v184_v50, %v184_v50 }
 0x13c   :  { %v186_v52 = vrot.slane %v185_v51, 4 }
 0x13e   :  { %v187_v53 = vadd.f32 %v186_v52, %v185_v51 }
 0x140   :  { %v188_v54 = vrot.slane %v187_v53, 2 }
 0x142   :  { %v189_v55 = vadd.f32 %v188_v54, %v187_v53 }
 0x144   :  { %v190_v56 = vrot.slane %v189_v55, 1 }
 0x146   :  { %v191_v57 = vadd.f32 %v190_v56, %v189_v55 }
 0x148   :  { %v192_v58 = vmul.f32 0.125, %v191_v57 }
 0x14a   :  { %v194_v59 = vadd.f32 1e-05, %v192_v58 }
 0x14c   :  { %502 = vrsqrt.f32 %v194_v59 }
 0x156   :  { %v503_v60 = vpop.eup %502 }
 0x157   :  { %v196_v62 = vmul.f32 %v503_v60, %v184_v50 }
 0x159   :  { %v203_v0 = vmul.f32 %v370_v61, %v196_v62 }
 0x15b   :  { %v211_v2 = vadd.f32 %v371_v63, %v203_v0 }
 0x15d   :  { %vm213_vm2 = vcmp.gt.f32.partialorder %v211_v2, 0.0  ;;  %v215_v3 = vmul.f32 %v214_v1, %v211_v2 }
 0x15f   :  { %v216_v4 = vsel %vm213_vm2, %v211_v2, %v215_v3 }
 0x160   :  { %454 = vmatmul.mubr.f32.vlgmr.msra.gmra.mrb[0].mxu1 %v216_v4 }
 0x233   :  { %v306_v6 = vpop.f32.mrb[0].mxu1 }
 0x234   :  { %v307_v7 = vadd.f32 %v372_v5, %v306_v6  ;;  %v455_v8 = vpop.f32.mrb[1].mxu1 }
 0x236   :  { %v310_v9 = vrot.slane %v307_v7, 4 }
 0x238   :  { %v311_v10 = vadd.f32 %v310_v9, %v307_v7 }
 0x23a   :  { %v312_v11 = vrot.slane %v311_v10, 2 }
 0x23c   :  { %v313_v12 = vadd.f32 %v312_v11, %v311_v10 }
 0x23e   :  { %v314_v13 = vrot.slane %v313_v12, 1 }
 0x240   :  { %v315_v14 = vadd.f32 %v314_v13, %v313_v12 }
 0x242   :  { %v316_v15 = vmul.f32 0.125, %v315_v14 }
 0x244   :  { %v317_v16 = vsub.f32 %v307_v7, %v316_v15 }
 0x246   :  { %v318_v17 = vmul.f32 %v317_v16, %v317_v16 }
 0x248   :  { %v319_v18 = vrot.slane %v318_v17, 4 }
 0x24a   :  { %v320_v19 = vadd.f32 %v319_v18, %v318_v17 }
 0x24c   :  { %v321_v20 = vrot.slane %v320_v19, 2 }
 0x24e   :  { %v322_v21 = vadd.f32 %v321_v20, %v320_v19 }
 0x250   :  { %v323_v22 = vrot.slane %v322_v21, 1 }
 0x252   :  { %v324_v23 = vadd.f32 %v323_v22, %v322_v21 }
 0x254   :  { %v325_v24 = vmul.f32 0.125, %v324_v23 }
 0x256   :  { %v327_v25 = vadd.f32 1e-05, %v325_v24 }
 0x258   :  { %504 = vrsqrt.f32 %v327_v25 }
 0x262   :  { %v505_v26 = vpop.eup %504 }
 0x263   :  { %v329_v28 = vmul.f32 %v505_v26, %v317_v16 }
 0x265   :  { %v336_v30 = vmul.f32 %v373_v27, %v329_v28 }
 0x267   :  { %v344_v32 = vadd.f32 %v374_v29, %v336_v30 }
 0x269   :  { %vm346_vm3 = vcmp.gt.f32.partialorder %v344_v32, 0.0  ;;  %v348_v33 = vmul.f32 %v347_v31, %v344_v32 }
 0x26b   :  { %v349_v34 = vsel %vm346_vm3, %v344_v32, %v348_v33 }
 0x26c   :  { %350 = vst [vmem:[#allocation10] sm:$0xff] %v349_v34 }
 0x26d   :  { %593 = shalt.err (!%p590_p3)
}
 0x26e   :  { %s594_s9 = scalar_lea.hbm %s790_s10, 128 }
 0x26f   :  { %p595_p4 = scmp.ne.s32.totalorder %s790_s10, %s594_s9  ;;  %p598_p5 = scmp.lt.u32.totalorder %s594_s9, %s790_s10 }
 0x271   :  { %p600_p6 = pnand %p598_p5, %p595_p4 }
 0x273   :  { %603 = shalt.err (!%p600_p6)
}
 0x274   :  { %360 = dma.vmem_to_hbm [thread:$0]  %s358_s0, 128, %s790_s10, [#allocation4]  }
 0x275   :  { %610 = dma.done.wait [#allocation4], 128  }
 0x276   :  { %611 = vsyncadd [#allocation4], 4294967168 }
 0x277   :  { %364 = vsyncpa [#allocation3], 1 }
 0x278   :  { %365 = vsyncpa [#allocation8], 1 }
 0x279   :  { %366 = vsyncpa [#allocation4], 1 }
 0x27a   :  { %367 = vsyncpa [#allocation5], 1 }

</bundles_post_ra>
